<compile_context>
chip_gen: v5e
topology: v5e:2x2
jax: 0.10.0
libtpu: 0.0.40
codegen_flags: <defaults>
</compile_context>

<pallas_src>
import functools
import math

import jax
import jax.numpy as jnp
from jax import lax
from jax.experimental import pallas as pl
from jax.experimental.pallas import tpu as pltpu


def _cdiv(a, b):
    return -(-a // b)


def _round_up(a, b):
    return _cdiv(a, b) * b


# Use the "fold rows into lanes" layout only while the folded lane width stays
# moderate; otherwise stream the native (N, C) layout (full-dim lane block).
_MAX_FOLD_LANES = 16384


def _wbce_kernel(x_ref, t_ref, pw_ref, nw_ref, o_ref, *,
                 total_valid, lane_width, block_rows, chunks_per_core,
                 needs_mask):
    """One grid step: weighted BCE on a (block_rows, lane_width) tile,
    accumulated into a lane-shaped (8, lane_width) partial-sum output block."""
    i = pl.program_id(1)          # reduction ("arbitrary") axis

    @pl.when(i == 0)
    def _():
        o_ref[...] = jnp.zeros_like(o_ref)

    x = x_ref[...].astype(jnp.float32)      # (block_rows, L)
    t = t_ref[...].astype(jnp.float32)      # (block_rows, L)
    pw = pw_ref[...]                        # (1, L) f32: pos_weight * weight
    nw = nw_ref[...]                        # (1, L) f32: weight (ones if None)

    # loss = -(pos_weight*weight) * t * log(x) - weight * (1 - t) * log(1 - x)
    # (two logs kept so non-binary targets keep exact reference semantics)
    loss = -(pw * t) * jnp.log(x) - (nw * (1.0 - t)) * jnp.log1p(-x)

    if needs_mask:
        # Zero the contribution of padded / out-of-range elements (flat-layout
        # lane padding, ragged partial blocks, clamped duplicate blocks).
        # Static `if` -> zero cost when the grid tiles the data exactly.
        # Row indices are computed from the *unclamped* logical block id so
        # duplicated (clamped) blocks contribute exactly 0.
        row_start = (pl.program_id(0) * chunks_per_core + i) * block_rows
        rows = row_start + lax.broadcasted_iota(jnp.int32, loss.shape, 0)
        lanes = lax.broadcasted_iota(jnp.int32, loss.shape, 1)
        full_rows = total_valid // lane_width
        rem = total_valid % lane_width
        valid = (rows < full_rows) | ((rows == full_rows) & (lanes < rem))
        loss = jnp.where(valid, loss, 0.0)

    # Lane-preserving accumulation: fold only the leading row-groups (pure VPU
    # adds, no XLU cross-lane reduce on the per-step critical path).
    o_ref[...] += jnp.sum(loss.reshape(-1, 8, lane_width), axis=0)


def weighted_bce_loss(sigmoid_x, targets, pos_weight=1.0, weight=None,
                      size_average=True, pos_weight_is_dynamic=False,
                      num_parallel=2, target_block_bytes=2 * 1024 * 1024):
    """Weighted BCE loss (reduce=True).  Returns a scalar f32 (mean if
    size_average else sum), matching the PyTorch module's reduced output."""
    # TODO(synk): reduce=False (per-element loss map output) is not implemented
    # in the Pallas path; only the reduced (sum / mean) forward is provided.
    sigmoid_x = jnp.asarray(sigmoid_x)
    targets = jnp.asarray(targets)
    if sigmoid_x.shape != targets.shape:
        raise ValueError(
            f"Target size ({targets.shape}) must be the same as input size "
            f"({sigmoid_x.shape})")
    if sigmoid_x.ndim != 2:
        raise ValueError("expected [N, C] inputs")
    n, c = sigmoid_x.shape
    total = n * c

    if pos_weight_is_dynamic:
        # Tiny [C] column reduction; done with plain jnp in the wrapper.
        pos_counts = jnp.sum(targets.astype(jnp.float32), axis=0)
        pos_weight = (n - pos_counts) / (pos_counts + 1e-5)

    pw_vec = jnp.broadcast_to(
        jnp.asarray(pos_weight, jnp.float32).reshape(-1), (c,))
    if weight is not None:
        w_vec = jnp.broadcast_to(
            jnp.asarray(weight, jnp.float32).reshape(-1), (c,))
    else:
        w_vec = jnp.ones((c,), jnp.float32)

    # ---- choose a lane-dense 2-D layout -----------------------------------
    fold_l = math.lcm(128, c)
    if fold_l <= _MAX_FOLD_LANES:
        # Fold rows into lanes: last dim = lcm(128, C); every lane is a real
        # element and the per-class weight pattern repeats cleanly per row.
        lane_width = fold_l
        reps = lane_width // c
        pw_row = jnp.tile(pw_vec * w_vec, reps)[None, :]
        nw_row = jnp.tile(w_vec, reps)[None, :]
        x2 = sigmoid_x.reshape(-1)
        t2 = targets.reshape(-1)
        # Minimal pad so the (free) reshape is exact; finite fill values keep
        # the padded logs well-defined (they are masked in-kernel anyway).
        lane_pad = (-total) % lane_width
        if lane_pad:
            x2 = jnp.pad(x2, (0, lane_pad), constant_values=0.5)
            t2 = jnp.pad(t2, (0, lane_pad), constant_values=0.0)
        rows = (total + lane_pad) // lane_width
        x2 = x2.reshape(rows, lane_width)
        t2 = t2.reshape(rows, lane_width)
    else:
        # Stream the native (N, C) layout: full-dim lane block (no column
        # padding, no wrapper copy).  Hardware lane padding to the next
        # multiple of 128 is handled by Mosaic.
        lane_width = c
        rows = n
        pw_row = (pw_vec * w_vec)[None, :]
        nw_row = w_vec[None, :]
        x2 = sigmoid_x
        t2 = targets

    # ---- tile sizing (~target_block_bytes per streamed input block) --------
    bytes_per_row = lane_width * x2.dtype.itemsize
    rows_per_core = _cdiv(rows, num_parallel)
    block_rows = max(8, min((target_block_bytes // bytes_per_row) // 8 * 8,
                            _round_up(rows_per_core, 8)))
    nblocks = _cdiv(rows, block_rows)
    chunks_per_core = _cdiv(nblocks, num_parallel)

    # Grid points whose logical row-block would start past the end of the
    # array have their block index clamped (DMA stays in-bounds); the in-kernel
    # mask (based on the unclamped logical position) zeroes their contribution.
    needs_clamp = num_parallel * chunks_per_core > nblocks
    if needs_clamp:
        def row_block_index(p, i, _cpc=chunks_per_core, _nb=nblocks):
            return jnp.minimum(p * _cpc + i, _nb - 1)
    else:
        def row_block_index(p, i, _cpc=chunks_per_core):
            return p * _cpc + i

    covered_elems = num_parallel * chunks_per_core * block_rows * lane_width
    needs_mask = covered_elems != total   # exact tiling -> no mask emitted

    kernel = functools.partial(
        _wbce_kernel,
        total_valid=total, lane_width=lane_width, block_rows=block_rows,
        chunks_per_core=chunks_per_core, needs_mask=needs_mask)

    partials = pl.pallas_call(
        kernel,
        out_shape=jax.ShapeDtypeStruct((num_parallel * 8, lane_width),
                                       jnp.float32),
        grid_spec=pltpu.PrefetchScalarGridSpec(
            num_scalar_prefetch=0,
            grid=(num_parallel, chunks_per_core),
            in_specs=[
                pl.BlockSpec((block_rows, lane_width),
                             lambda p, i: (row_block_index(p, i), 0)),
                pl.BlockSpec((block_rows, lane_width),
                             lambda p, i: (row_block_index(p, i), 0)),
                pl.BlockSpec((1, lane_width), lambda p, i: (0, 0)),
                pl.BlockSpec((1, lane_width), lambda p, i: (0, 0)),
            ],
            out_specs=pl.BlockSpec((8, lane_width), lambda p, i: (p, 0)),
        ),
        compiler_params=pltpu.CompilerParams(
            dimension_semantics=("parallel", "arbitrary"),
            vmem_limit_bytes=32 * 1024 * 1024,
        ),
    )(x2, t2, pw_row, nw_row)

    total_sum = jnp.sum(partials)          # tiny final reduce in XLA
    if size_average:
        return total_sum / total
    return total_sum


def weighted_bce_loss_ref(sigmoid_x, targets, pos_weight, weight=None,
                          size_average=True):
    """Pure-JAX reference mirroring the PyTorch function."""
    x = jnp.asarray(sigmoid_x).astype(jnp.float32)
    t = jnp.asarray(targets).astype(jnp.float32)
    pw = jnp.asarray(pos_weight, jnp.float32)
    loss = -pw * t * jnp.log(x) - (1.0 - t) * jnp.log1p(-x)
    if weight is not None:
        loss = loss * jnp.asarray(weight, jnp.float32)
    return jnp.mean(loss) if size_average else jnp.sum(loss)


if __name__ == "__main__":
    key = jax.random.PRNGKey(0)
    k1, k2, k3, k4 = jax.random.split(key, 4)

    # --- primary check: [N, C] = [16, 32], per-class pos_weight [1, C] ------
    N, C = 16, 32
    sigmoid_x = jax.nn.sigmoid(jax.random.normal(k1, (N, C), dtype=jnp.float32))
    targets = (jax.random.uniform(k2, (N, C)) > 0.5).astype(jnp.float32)
    pos_weight = 1.0 + 0.1 * jnp.arange(C, dtype=jnp.float32).reshape(1, C)

    out = jax.block_until_ready(weighted_bce_loss(sigmoid_x, targets, pos_weight))
    ref = weighted_bce_loss_ref(sigmoid_x, targets, pos_weight)
    assert jnp.allclose(out, ref, rtol=1e-5, atol=1e-5), (out, ref)

    # --- odd shapes + scalar pos_weight + per-class weight ------------------
    N2, C2 = 7, 5
    x2 = jax.nn.sigmoid(jax.random.normal(k3, (N2, C2), dtype=jnp.float32))
    t2 = (jax.random.uniform(k4, (N2, C2)) > 0.3).astype(jnp.float32)
    w2 = 0.5 + 0.25 * jnp.arange(C2, dtype=jnp.float32).reshape(1, C2)
    out2 = jax.block_until_ready(weighted_bce_loss(x2, t2, 2.0, weight=w2))
    ref2 = weighted_bce_loss_ref(x2, t2, 2.0, weight=w2)
    assert jnp.allclose(out2, ref2, rtol=1e-5, atol=1e-5), (out2, ref2)

    # --- bf16 inputs are streamed as bf16 (HBM-bandwidth saving) ------------
    xb = sigmoid_x.astype(jnp.bfloat16)
    tb = targets.astype(jnp.bfloat16)
    out3 = jax.block_until_ready(weighted_bce_loss(xb, tb, pos_weight))
    ref3 = weighted_bce_loss_ref(xb, tb, pos_weight)
    assert jnp.allclose(out3, ref3, rtol=1e-5, atol=1e-5), (out3, ref3)

    # --- PosWeightIsDynamic path (pos_weight computed from the batch) -------
    counts = jnp.sum(targets, axis=0)
    pw_dyn = (N - counts) / (counts + 1e-5)
    out4 = jax.block_until_ready(
        weighted_bce_loss(sigmoid_x, targets, pos_weight_is_dynamic=True))
    ref4 = weighted_bce_loss_ref(sigmoid_x, targets, pw_dyn[None, :])
    assert jnp.allclose(out4, ref4, rtol=1e-5, atol=1e-5), (out4, ref4)

    print("KERNEL_OK")
</pallas_src>

<mosaic_0001>
module attributes {stable_mosaic.version = 11 : i64} {
  func.func @_wbce_kernel(%arg0: i32, %arg1: i32, %arg2: memref<8x128xf32, #tpu.memory_space<vmem>>, %arg3: memref<8x128xf32, #tpu.memory_space<vmem>>, %arg4: memref<1x128xf32, #tpu.memory_space<vmem>>, %arg5: memref<1x128xf32, #tpu.memory_space<vmem>>, %arg6: memref<8x128xf32, #tpu.memory_space<vmem>>) attributes {dimension_semantics = [#tpu.dimension_semantics<parallel>, #tpu.dimension_semantics<arbitrary>], iteration_bounds = array<i64: 2, 1>, scalar_prefetch = 0 : i64, scratch_operands = 0 : i64, tpu.core_type = #tpu.core_type<tc>, window_params = [{transform_indices = @transform_0, window_bounds = array<i64: 8, 128>}, {transform_indices = @transform_1, window_bounds = array<i64: 8, 128>}, {pipeline_mode = #tpu.pipeline_mode<synchronous>, transform_indices = @transform_2, window_bounds = array<i64: 1, 128>}, {pipeline_mode = #tpu.pipeline_mode<synchronous>, transform_indices = @transform_3, window_bounds = array<i64: 1, 128>}, {transform_indices = @transform_4, window_bounds = array<i64: 8, 128>}]} {
    %c0_i32 = arith.constant 0 : i32
    %0 = arith.cmpi eq, %arg1, %c0_i32 : i32
    %1 = arith.extui %0 : i1 to i32
    %c0_i32_0 = arith.constant 0 : i32
    %2 = arith.cmpi ne, %1, %c0_i32_0 : i32
    scf.if %2 {
      %cst_18 = arith.constant 0.000000e+00 : f32
      %44 = vector.broadcast %cst_18 : f32 to vector<8x128xf32>
      %c0_19 = arith.constant 0 : index
      %c0_20 = arith.constant 0 : index
      %45 = vector.load %arg6[%c0_19, %c0_20] : memref<8x128xf32, #tpu.memory_space<vmem>>, vector<8x128xf32>
      tpu.vector_store %arg6[%c0_19, %c0_20], %44 {strides = array<i32>} : memref<8x128xf32, #tpu.memory_space<vmem>>, vector<8x128xf32>,
    } else {
    }
    %c0 = arith.constant 0 : index
    %c0_1 = arith.constant 0 : index
    %3 = vector.load %arg2[%c0, %c0_1] : memref<8x128xf32, #tpu.memory_space<vmem>>, vector<8x128xf32>
    %c0_2 = arith.constant 0 : index
    %c0_3 = arith.constant 0 : index
    %4 = vector.load %arg3[%c0_2, %c0_3] : memref<8x128xf32, #tpu.memory_space<vmem>>, vector<8x128xf32>
    %c0_4 = arith.constant 0 : index
    %c0_5 = arith.constant 0 : index
    %5 = vector.load %arg4[%c0_4, %c0_5] : memref<1x128xf32, #tpu.memory_space<vmem>>, vector<1x128xf32>
    %c0_6 = arith.constant 0 : index
    %c0_7 = arith.constant 0 : index
    %6 = vector.load %arg5[%c0_6, %c0_7] : memref<1x128xf32, #tpu.memory_space<vmem>>, vector<1x128xf32>
    %7 = vector.broadcast %5 : vector<1x128xf32> to vector<8x128xf32>
    %8 = arith.mulf %7, %4 : vector<8x128xf32>
    %cst = arith.constant 0.000000e+00 : f32
    %9 = vector.broadcast %cst : f32 to vector<8x128xf32>
    %10 = arith.subf %9, %8 : vector<8x128xf32>
    %11 = math.log %3 : vector<8x128xf32>
    %12 = arith.mulf %10, %11 : vector<8x128xf32>
    %cst_8 = arith.constant 1.000000e+00 : f32
    %13 = vector.broadcast %cst_8 : f32 to vector<8x128xf32>
    %14 = arith.subf %13, %4 : vector<8x128xf32>
    %15 = vector.broadcast %6 : vector<1x128xf32> to vector<8x128xf32>
    %16 = arith.mulf %15, %14 : vector<8x128xf32>
    %cst_9 = arith.constant 0.000000e+00 : f32
    %17 = vector.broadcast %cst_9 : f32 to vector<8x128xf32>
    %18 = arith.subf %17, %3 : vector<8x128xf32>
    %19 = math.log1p %18 : vector<8x128xf32>
    %20 = arith.mulf %16, %19 : vector<8x128xf32>
    %21 = arith.subf %12, %20 : vector<8x128xf32>
    %c1_i32 = arith.constant 1 : i32
    %22 = arith.muli %arg0, %c1_i32 : i32
    %23 = arith.addi %22, %arg1 : i32
    %c8_i32 = arith.constant 8 : i32
    %24 = arith.muli %23, %c8_i32 : i32
    %25 = tpu.iota {dimensions = array<i32: 0>} : vector<8x128xi32>
    %26 = vector.broadcast %24 : i32 to vector<8x128xi32>
    %27 = arith.addi %26, %25 : vector<8x128xi32>
    %28 = tpu.iota {dimensions = array<i32: 1>} : vector<8x128xi32>
    %c4_i32 = arith.constant 4 : i32
    %29 = vector.broadcast %c4_i32 : i32 to vector<8x128xi32>
    %30 = arith.cmpi slt, %27, %29 : vector<8x128xi32>
    %c4_i32_10 = arith.constant 4 : i32
    %31 = vector.broadcast %c4_i32_10 : i32 to vector<8x128xi32>
    %32 = arith.cmpi eq, %27, %31 : vector<8x128xi32>
    %c0_i32_11 = arith.constant 0 : i32
    %33 = vector.broadcast %c0_i32_11 : i32 to vector<8x128xi32>
    %34 = arith.cmpi slt, %28, %33 : vector<8x128xi32>
    %35 = arith.andi %32, %34 : vector<8x128xi1>
    %36 = arith.ori %30, %35 : vector<8x128xi1>
    %cst_12 = arith.constant 0.000000e+00 : f32
    %37 = vector.broadcast %cst_12 : f32 to vector<8x128xf32>
    %38 = arith.select %36, %21, %37 : vector<8x128xi1>, vector<8x128xf32>
    %c0_13 = arith.constant 0 : index
    %c0_14 = arith.constant 0 : index
    %39 = vector.load %arg6[%c0_13, %c0_14] : memref<8x128xf32, #tpu.memory_space<vmem>>, vector<8x128xf32>
    %40 = vector.shape_cast %38 : vector<8x128xf32> to vector<1x8x128xf32>
    %cst_15 = arith.constant dense<0.000000e+00> : vector<8x128xf32>
    %41 = vector.multi_reduction <add>, %40, %cst_15 [0] : vector<1x8x128xf32> to vector<8x128xf32>
    %42 = arith.addf %39, %41 : vector<8x128xf32>
    %c0_16 = arith.constant 0 : index
    %c0_17 = arith.constant 0 : index
    %43 = vector.load %arg6[%c0_16, %c0_17] : memref<8x128xf32, #tpu.memory_space<vmem>>, vector<8x128xf32>
    tpu.vector_store %arg6[%c0_16, %c0_17], %42 {strides = array<i32>} : memref<8x128xf32, #tpu.memory_space<vmem>>, vector<8x128xf32>,
    return
  }
  func.func @transform_0(%arg0: i32, %arg1: i32) -> (i32, i32) {
    %c1_i32 = arith.constant 1 : i32
    %0 = arith.muli %arg0, %c1_i32 : i32
    %1 = arith.addi %0, %arg1 : i32
    %c0_i32 = arith.constant 0 : i32
    %2 = arith.minsi %1, %c0_i32 : i32
    %c0_i32_0 = arith.constant 0 : i32
    %c0_i32_1 = arith.constant 0 : i32
    return %2, %c0_i32_0 : i32, i32
  }
  func.func @transform_1(%arg0: i32, %arg1: i32) -> (i32, i32) {
    %c1_i32 = arith.constant 1 : i32
    %0 = arith.muli %arg0, %c1_i32 : i32
    %1 = arith.addi %0, %arg1 : i32
    %c0_i32 = arith.constant 0 : i32
    %2 = arith.minsi %1, %c0_i32 : i32
    %c0_i32_0 = arith.constant 0 : i32
    %c0_i32_1 = arith.constant 0 : i32
    return %2, %c0_i32_0 : i32, i32
  }
  func.func @transform_2(%arg0: i32, %arg1: i32) -> (i32, i32) {
    %c0_i32 = arith.constant 0 : i32
    %c0_i32_0 = arith.constant 0 : i32
    %c0_i32_1 = arith.constant 0 : i32
    return %c0_i32, %c0_i32_0 : i32, i32
  }
  func.func @transform_3(%arg0: i32, %arg1: i32) -> (i32, i32) {
    %c0_i32 = arith.constant 0 : i32
    %c0_i32_0 = arith.constant 0 : i32
    %c0_i32_1 = arith.constant 0 : i32
    return %c0_i32, %c0_i32_0 : i32, i32
  }
  func.func @transform_4(%arg0: i32, %arg1: i32) -> (i32, i32) {
    %c0_i32 = arith.constant 0 : i32
    %c0_i32_0 = arith.constant 0 : i32
    return %arg0, %c0_i32 : i32, i32
  }
}

</mosaic_0001>

<bundles_post_ra>
// kernel: tpu_custom_call.1
= control target key start
LH: loop header
LB: loop body
LE: loop exit
PB: predicated region body
PF: predicated region fallthrough
CT: control target
= control target key end

     0   :  { %9 = vsyncpa [#allocation3], 0  ;;  %s975_s0 = inlined_call_operand.hbm [shape: f32[4,128], index: 0, kind: input, shape index: {}]   ;;  %s976_s1 = inlined_call_operand.hbm [shape: f32[4,128], index: 1, kind: input, shape index: {}]   ;;  %s977_s2 = inlined_call_operand.vmem [shape: f32[1,128], index: 2, kind: input, shape index: {}]   ;;  %s978_s3 = inlined_call_operand.vmem [shape: f32[1,128], index: 3, kind: input, shape index: {}]   ;;  %s979_s4 = inlined_call_operand.hbm [shape: f32[16,128], index: 4, kind: output, shape index: {}]  }
   0x1   :  { %11 = vsyncpa [#allocation3 + $0x1], 0 }
   0x2   :  { %12 = vsyncpa [#allocation6], 0 }
   0x3   :  { %14 = vsyncpa [#allocation6 + $0x1], 0 }
   0x4   :  { %15 = vsyncpa [#allocation4], 0 }
   0x5   :  { %17 = vsyncpa [#allocation4 + $0x1], 0  ;;  %s824_s15 = smov 0   ;;  %s826_s16 = smov 0  }
   0x6   :  { %s828_s17 = smov 0   ;;  %s830_s18 = smov 0  }
   0x7   :  { %s832_s19 = smov 0   ;;  %s834_s20 = smov 0  }
   0x8   :  { %s836_s21 = smov 0   ;;  %s838_s22 = smov 0  }
   0x9 LB: > { %s481_s23 = sadd.s32 4294967295, %s791_s22   ;;  %s482_s24 = sadd.s32 4294967294, %s791_s22   ;;  %s791_s22 = sphi %s838_s22, %s23_s22   ;;  %s787_s21 = sphi %s836_s21, %s989_s21   ;;  %s783_s20 = sphi %s834_s20, %s988_s20   ;;  %s779_s19 = sphi %s832_s19, %s965_s19   ;;  %s775_s18 = sphi %s830_s18, %s987_s18   ;;  %s771_s17 = sphi %s828_s17, %s986_s17   ;;  %s767_s16 = sphi %s826_s16, %s985_s16   ;;  %s763_s15 = sphi %s824_s15, %s984_s15  }
   0xa   : > { %s35_s25 = sadd.s32 1, %s787_s21  ;;  %p760_p1 = scmp.ne.s32.totalorder %s779_s19, 0 }
   0xb   : > { %p37_p0 = scmp.ge.s32.totalorder %s35_s25, 2  ;;  %p56_p2 = scmp.eq.s32.totalorder %s791_s22, 0 }
   0xc   : > { %p61_p3 = scmp.ne.s32.totalorder %s779_s19, %s775_s18  ;;  %p62_p5 = scmp.eq.s32.totalorder %s481_s23, 0 }
   0xd   : > { %s991_s25 = smov (%p37_p0, %s35_s25), 0  ;;  %p870_p4 = por %p760_p1, %p56_p2 }
   0xe   : > { %p874_p6 = por %p62_p5, %p61_p3  ;;  %s145_s28 = ssub.s32 %s787_s21, %s991_s25 }
   0xf   : > { %p146_p7 = scmp.eq.s32.totalorder %s145_s28, 0  ;;  %s148_s29 = sadd.s32 1, %s771_s17 }
  0x10   : > { %p158_p8 = scmp.ne.s32.totalorder %s771_s17, %s767_s16  ;;  %p159_p9 = scmp.eq.s32.totalorder %s481_s23, 1 }
  0x11   : > { %s882_s30 = scalar_select %p146_p7, %s771_s17, %s148_s29  }
  0x12   : > { %p164_p10 = scmp.ne.s32.totalorder %s767_s16, %s763_s15  ;;  %p165_p11 = scmp.eq.s32.totalorder %s482_s24, 1 }
  0x13   : > { %p888_p12 = por %p159_p9, %p158_p8  ;;  %p484_p0 = scmp.ge.s32.totalorder %s791_s22, 2 }
  0x14   : > { %p892_p13 = por %p165_p11, %p164_p10 }
  0x15   : > { %187 = sbr.rel (%p484_p0) target bundleno = 70 (0x46), region = 24 }
  0x1a   : > { %190 = sbr.rel (!%p870_p4) target bundleno = 48 (0x30), region = 28 }
  0x1f   : > { %204 = vsyncadd [#allocation3], 64  ;;  %s793_s7 = smov [#allocation2]   ;;  %s209_s11 = sshll.u32 %s975_s0, 4  ;;  %s210_s11 = int_to_ptr.hbm [resolvable:$true] %s209_s11 }
  0x20   : > { %s211_s8 = sshll.u32 %s793_s7, 4  ;;  %s602_s12 = sshra.s32 %s210_s11, 4  ;;  %s212_s8 = int_to_ptr.vmem [resolvable:$true] %s211_s8  ;;  %s603_s12 = int_to_ptr.hbm [resolvable:$true] %s602_s12 }
  0x21   : > { %s609_s13 = scalar_lea.hbm %s603_s12, 4  ;;  %s613_s23 = scalar_lea.hbm %s975_s0, 4 }
  0x22   : > { %p610_p1 = scmp.ne.s32.totalorder %s603_s12, %s609_s13  ;;  %p615_p2 = scmp.lt.s32.totalorder %s613_s23, %s609_s13 }
  0x24   : > { %p617_p3 = pnand %p615_p2, %p610_p1 }
  0x26   : > { %620 = shalt.err (!%p617_p3)
}
  0x27   : > { %s621_s24 = sshra.s32 %s212_s8, 4  ;;  %s632_s29 = scalar_lea.vmem %s793_s7, 16  ;;  %s622_s24 = int_to_ptr.vmem [resolvable:$true] %s621_s24 }
  0x28   : > { %s628_s28 = scalar_lea.vmem %s622_s24, 4 }
  0x29   : > { %p629_p5 = scmp.ne.s32.totalorder %s622_s24, %s628_s28  ;;  %p634_p7 = scmp.lt.s32.totalorder %s632_s29, %s628_s28 }
  0x2b   : > { %p636_p8 = pnand %p634_p7, %p629_p5 }
  0x2d   : > { %639 = shalt.err (!%p636_p8)
}
  0x2e   : > { %s794_s9 = smov 64   ;;  %s795_s10 = smov 4  }
  0x2f   : > { %217 = dma.hbm_to_vmem [thread:$0]  %s210_s11, 64, %s212_s8, [#allocation3], %s794_s9, %s794_s9, %s795_s10  }
  0x30 PF: > { %220 = sbr.rel (!%p870_p4) target bundleno = 70 (0x46), region = 32 }
  0x35   : > { %234 = vsyncadd [#allocation6], 64  ;;  %s796_s12 = smov [#allocation5]   ;;  %s239_s23 = sshll.u32 %s976_s1, 4  ;;  %s240_s23 = int_to_ptr.hbm [resolvable:$true] %s239_s23 }
  0x36   : > { %s241_s13 = sshll.u32 %s796_s12, 4  ;;  %s641_s7 = sshra.s32 %s240_s23, 4  ;;  %s242_s13 = int_to_ptr.vmem [resolvable:$true] %s241_s13  ;;  %s642_s7 = int_to_ptr.hbm [resolvable:$true] %s641_s7 }
  0x37   : > { %s648_s24 = scalar_lea.hbm %s642_s7, 4  ;;  %s652_s8 = scalar_lea.hbm %s976_s1, 4 }
  0x38   : > { %p649_p9 = scmp.ne.s32.totalorder %s642_s7, %s648_s24  ;;  %p654_p10 = scmp.lt.s32.totalorder %s652_s8, %s648_s24 }
  0x3a   : > { %p656_p11 = pnand %p654_p10, %p649_p9 }
  0x3c   : > { %659 = shalt.err (!%p656_p11)
}
  0x3d   : > { %s660_s26 = sshra.s32 %s242_s13, 4  ;;  %s671_s9 = scalar_lea.vmem %s796_s12, 16  ;;  %s661_s26 = int_to_ptr.vmem [resolvable:$true] %s660_s26 }
  0x3e   : > { %s667_s11 = scalar_lea.vmem %s661_s26, 4 }
  0x3f   : > { %p668_p4 = scmp.ne.s32.totalorder %s661_s26, %s667_s11  ;;  %p673_p1 = scmp.lt.s32.totalorder %s671_s9, %s667_s11 }
  0x41   : > { %p675_p2 = pnand %p673_p1, %p668_p4 }
  0x43   : > { %678 = shalt.err (!%p675_p2)
}
  0x44   : > { %s797_s10 = smov 64   ;;  %s798_s14 = smov 4  }
  0x45   : > { %247 = dma.hbm_to_vmem [thread:$0]  %s240_s23, 64, %s242_s13, [#allocation6], %s797_s10, %s797_s10, %s798_s14  }
  0x46 PF: > { %p499_p3 = scmp.ge.s32.totalorder %s791_s22, 1  ;;  %p249_p5 = scmp.lt.s32.totalorder %s791_s22, 3 }
  0x48   : > { %p250_p7 = pnand %p499_p3, %p249_p5 }
  0x49   : > { %s255_s18 = sand.u32 (!%p250_p7), 1, %s779_s19  }
  0x4a   : > { %253 = sbr.rel (%p250_p7) target bundleno = 105 (0x69), region = 36  ;;  %s500_s7 = sshll.u32 (!%p250_p7), %s255_s18, 3 }
  0x4b   : > { %s256_s24 = scalar_lea.sflag (!%p250_p7), [#allocation3], %s255_s18  ;;  %s259_s12 = scalar_lea.vmem (!%p250_p7), [#allocation2], %s500_s7 }
  0x4f   : > { %745 = dma.done.wait (%p874_p6), %s256_s24, 128  }
  0x50   : > { %747 = vsyncadd (%p874_p6), %s256_s24, 4294967168  ;;  %s266_s13 = scalar_lea.sflag [#allocation6], %s255_s18  ;;  %s269_s23 = scalar_lea.vmem [#allocation5], %s500_s7 }
  0x51   : > { %749 = dma.done.wait (%p874_p6), %s266_s13, 128  }
  0x52   : > { %751 = vsyncadd (%p874_p6), %s266_s13, 4294967168  ;;  %v317_v0 = vld [vmem:[%s259_s12] sm:$0xff]  ;;  %v318_v3 = vld [vmem:[%s269_s23] sm:$0xff]  ;;  %v348_v6 = vlaneseq  ;;  %s503_s8 = sshll.u32 %s783_s20, 3  ;;  %s297_s11 = sand.u32 1, %s767_s16  }
  0x53   : > { %v596_v1 = vld [vmem:[%s977_s2] ss:$0 sm:$0xff]  ;;  %598 = vlog2.f32 %v317_v0  ;;  %v334_v2 = vsub.f32 0.0, %v317_v0  ;;  %v329_v10 = vsub.f32 1.0, %v318_v3  ;;  %v350_v16 = vstv %s503_s8  ;;  %s502_s9 = sshll.u32 %s297_s11, 3  ;;  %s375_s14 = scalar_lea.hbm %s979_s4, %s503_s8 }
  0x54   : > { %v324_v7 = vmul.f32 %v596_v1, %v318_v3  ;;  %v597_v11 = vld [vmem:[%s978_s3] ss:$0 sm:$0xff]  ;;  %v349_v13 = vshrl.u32 %v348_v6, 7  ;;  %s299_s18 = scalar_lea.vmem [#allocation7], %s502_s9  ;;  %s379_s24 = sshll.u32 %s375_s14, 4  ;;  %s380_s24 = int_to_ptr.hbm [resolvable:$true] %s379_s24 }
  0x55   : > { %v335_v4 = vadd.f32 1.0, %v334_v2  ;;  %v338_v5 = vmul.f32 -0.5, %v334_v2  ;;  %v341_v12 = vand.u32 2147483647, %v334_v2  ;;  %v333_v19 = vmul.f32 %v597_v11, %v329_v10  ;;  %s377_s7 = sshll.u32 %s299_s18, 4  ;;  %s365_s12 = scalar_lea.sflag [#allocation4], %s297_s11  ;;  %s378_s7 = int_to_ptr.vmem [resolvable:$true] %s377_s7 }
  0x56   : > { %v325_v14 = vsub.f32 0.0, %v324_v7  ;;  %v351_v21 = vadd.s32 %v350_v16, %v349_v13  ;;  %s694_s13 = sshra.s32 %s380_s24, 4  ;;  %s700_s8 = scalar_lea.hbm %s979_s4, 16  ;;  %s695_s13 = int_to_ptr.hbm [resolvable:$true] %s694_s13 }
  0x57   : > { %600 = vlog2.f32 %v335_v4  ;;  %v339_v8 = vadd.f32 1.0, %v338_v5  ;;  %vm342_vm0 = vcmp.lt.f32.partialorder %v341_v12, 0.0004427343  ;;  %s696_s23 = scalar_lea.hbm %s695_s13, 8  ;;  %p701_p10 = scmp.lt.s32.totalorder %s695_s13, %s979_s4 }
  0x58   : > { %vm354_vm1 = vcmp.lt.s32.totalorder %v351_v21, 4  ;;  %p697_p6 = scmp.ne.s32.totalorder %s695_s13, %s696_s23  ;;  %p702_p11 = scmp.lt.s32.totalorder %s700_s8, %s696_s23 }
  0x59   : > { %v599_v9 = vpop.eup %598  ;;  %v340_v17 = vmul.f32 %v339_v8, %v334_v2 }
  0x5a   : > { %v327_v15 = vmul.f32 0.6931472, %v599_v9  ;;  %p698_p8 = pnand %p697_p6, %p888_p12  ;;  %p703_p4 = por %p702_p11, %p701_p10 }
  0x5c   : > { %v328_v22 = vmul.f32 %v327_v15, %v325_v14  ;;  %p699_p9 = pneg %p698_p8 }
  0x5d   : > { %v601_v18 = vpop.eup %600 }
  0x5e   : > { %v337_v20 = vmul.f32 0.6931472, %v601_v18  ;;  %p704_p1 = pnand %p703_p4, %p699_p9 }
  0x60   : > { %v343_v23 = vsel %vm342_vm0, %v340_v17, %v337_v20 }
  0x61   : > { %v344_v24 = vmul.f32 %v343_v23, %v333_v19 }
  0x63   : > { %v345_v25 = vsub.f32 %v328_v22, %v344_v24 }
  0x65   : > { %v359_v26 = vsel %vm354_vm1, %v345_v25, 0.0 }
  0x66   : > { %363 = vst [vmem:[%s299_s18] sm:$0xff] %v359_v26 }
  0x67   : > { %707 = shalt.err (!%p704_p1)
}
  0x68   : > { %512 = dma.vmem_to_hbm [thread:$0]  (%p888_p12), %s378_s7, 128, %s380_s24, %s365_s12  }
  0x69 PF: > { %s391_s11 = sand.u32 1, %s763_s15   ;;  %p515_p2 = pnand %p484_p0, %p892_p13 }
  0x6a   : > { %s392_s9 = scalar_lea.sflag [#allocation4], %s391_s11 }
  0x6b   : > { %p516_p3 = pneg %p515_p2 }
  0x6d   : > { %753 = dma.done.wait (%p516_p3), %s392_s9, 128  }
  0x6e   : > { %755 = vsyncadd (%p516_p3), %s392_s9, 4294967168  ;;  %s23_s22 = sadd.s32 1, %s791_s22   ;;  %s984_s15 = smov %s767_s16 }
  0x6f   : > { %p20_p5 = scmp.ge.s32.totalorder %s23_s22, 4   ;;  %s985_s16 = smov %s771_s17 }
  0x70   : > { %s986_s17 = smov %s882_s30  ;;  %s987_s18 = smov %s779_s19 }
  0x71   : > { %s965_s19 = smov 0   ;;  %s988_s20 = smov %s787_s21 }
  0x72   : > { %s989_s21 = smov %s991_s25  ;;  %22 = sbr.rel (!%p20_p5) target bundleno = 9 (0x9), region = 98 }
  0x77   :  { %398 = vsyncpa [#allocation3], 1 }
  0x78   :  { %400 = vsyncpa [#allocation3 + $0x1], 1 }
  0x79   :  { %401 = vsyncpa [#allocation6], 1 }
  0x7a   :  { %403 = vsyncpa [#allocation6 + $0x1], 1 }
  0x7b   :  { %404 = vsyncpa [#allocation4], 1 }
  0x7c   :  { %406 = vsyncpa [#allocation4 + $0x1], 1 }

</bundles_post_ra>
